<compile_context>
chip_gen: v7x
topology: tpu7x:2x2x1
jax: 0.10.0
libtpu: 0.0.40
codegen_flags: <defaults>
</compile_context>

<pallas_src>
import functools

import jax
import jax.numpy as jnp
from jax.experimental import pallas as pl
from jax.experimental.pallas import tpu as pltpu

_LANE = 128  # lane width; L tile is a multiple of this -> unmasked stores


def _lc1d_kernel(x_ref, w_ref, b_ref, o_ref):
    """One tile of TL output positions.

    x_ref: (B, M, TL)   unfolded input, M = C_in*K on sublanes, L on lanes
    w_ref: (O, M, TL)   per-position weights
    b_ref: (O, TL)      per-position bias
    o_ref: (B, O, TL)   output, lane-dense last dim (PyTorch layout)
    """
    w = w_ref[...].astype(jnp.float32)      # (O, M, TL) - read once per tile
    bias = b_ref[...].astype(jnp.float32)   # (O, TL)
    # Contraction depth M is tiny -> stay on the VPU (broadcast-multiply) with
    # a sublane reduction over M instead of per-position MXU matmuls.
    # B is small & static -> unrolled; each iteration does a full-tile,
    # lane-dense store of one (O, TL) slab.
    for bb in range(x_ref.shape[0]):
        xb = x_ref[bb].astype(jnp.float32)             # (M, TL)
        acc = jnp.sum(xb[None, :, :] * w, axis=1)      # (O, TL), f32 accumulation
        o_ref[bb] = (acc + bias).astype(o_ref.dtype)


def pack_params(weight, bias, *, tile_l=_LANE):
    """Repack module parameters ONCE (hoisted out of the per-call path).

    weight: (1, O, C, L, K) -> (O, C*K, L_pad)  (contraction dim on sublanes,
                                                 L lane-dense)
    bias:   (1, O, L)       -> (O, L_pad)
    L is zero-padded up to a multiple of tile_l so every block is (8,128)-tiled.
    """
    _, o_ch, c_in, l_out, k = weight.shape
    w_pack = jnp.transpose(weight[0], (0, 1, 3, 2)).reshape(o_ch, c_in * k, l_out)
    if bias is None:
        b_pack = jnp.zeros((o_ch, l_out), dtype=weight.dtype)
    else:
        b_pack = bias[0]
    l_extra = pl.cdiv(l_out, tile_l) * tile_l - l_out
    if l_extra:
        w_pack = jnp.pad(w_pack, ((0, 0), (0, 0), (0, l_extra)))
        b_pack = jnp.pad(b_pack, ((0, 0), (0, l_extra)))
    return w_pack, b_pack


def locally_connected_1d(x, w_pack, b_pack, *, kernel_size, stride, padding=0,
                         tile_l=_LANE):
    """Forward of LocallyConnected1d. x: (B, C_in, H). Returns (B, O, L)."""
    B, C, H = x.shape
    K = kernel_size
    O, M, L_pad = w_pack.shape
    assert M == C * K
    Hp = H + 2 * padding
    L = (Hp - K) // stride + 1
    assert L <= L_pad and L_pad % tile_l == 0
    n_tiles = L_pad // tile_l

    # --- glue (plain JAX): pad + unfold + put L on the lane axis -------------
    # TODO(synk): the overlapping strided unfold is a gather and cannot be
    # expressed as a rectangular BlockSpec window, so it stays as wrapper glue.
    x_pad = jnp.pad(x, ((0, 0), (0, 0), (padding, padding)))        # 'constant' mode
    idx = jnp.arange(L)[:, None] * stride + jnp.arange(K)[None, :]  # (L, K)
    x_unf = x_pad[:, :, idx]                                        # (B, C, L, K)
    x_lml = jnp.transpose(x_unf, (0, 1, 3, 2)).reshape(B, M, L)     # (B, M, L)
    if L_pad != L:
        x_lml = jnp.pad(x_lml, ((0, 0), (0, 0), (0, L_pad - L)))

    out = pl.pallas_call(
        _lc1d_kernel,
        out_shape=jax.ShapeDtypeStruct((B, O, L_pad), x.dtype),
        grid_spec=pltpu.PrefetchScalarGridSpec(
            num_scalar_prefetch=0,
            grid=(n_tiles,),                      # parallel over L tiles
            in_specs=[
                pl.BlockSpec((B, M, tile_l), lambda l: (0, 0, l)),
                pl.BlockSpec((O, M, tile_l), lambda l: (0, 0, l)),
                pl.BlockSpec((O, tile_l), lambda l: (0, l)),
            ],
            out_specs=pl.BlockSpec((B, O, tile_l), lambda l: (0, 0, l)),
        ),
        compiler_params=pltpu.CompilerParams(
            dimension_semantics=("parallel",)),
    )(x_lml, w_pack, b_pack)

    return out[:, :, :L]   # drop L padding; already in PyTorch (B, O, L) layout


def init_params(key, in_channels, out_channels, output_size, kernel_size):
    """Deterministic init matching the module: xavier_uniform weight, zero bias."""
    L, K = output_size, kernel_size
    recep = in_channels * L * K
    fan_in = out_channels * recep     # torch fan-in/out convention for this 5-D tensor
    fan_out = 1 * recep
    bound = (6.0 / (fan_in + fan_out)) ** 0.5
    weight = jax.random.uniform(
        key, (1, out_channels, in_channels, L, K),
        minval=-bound, maxval=bound, dtype=jnp.float32)
    bias = jnp.zeros((1, out_channels, L), dtype=jnp.float32)
    return weight, bias


if __name__ == "__main__":
    # Small shapes consistent with the module's forward.
    B, C_in, H = 2, 4, 16
    O_ch, K, stride, padding = 8, 4, 2, 2
    L = (H + 2 * padding - K) // stride + 1   # output_size[0]

    key = jax.random.PRNGKey(0)
    kx, kw = jax.random.split(key)
    x = jax.random.normal(kx, (B, C_in, H), dtype=jnp.float32)
    weight, bias = init_params(kw, C_in, O_ch, L, K)

    # Parameter repacking is done once, outside the per-call forward path.
    w_pack, b_pack = pack_params(weight, bias)

    fwd = jax.jit(functools.partial(locally_connected_1d,
                                    kernel_size=K, stride=stride, padding=padding))
    out = jax.block_until_ready(fwd(x, w_pack, b_pack))

    # Pure-JAX reference with identical semantics to the PyTorch module.
    x_pad = jnp.pad(x, ((0, 0), (0, 0), (padding, padding)))
    idx = jnp.arange(L)[:, None] * stride + jnp.arange(K)[None, :]
    x_unf = x_pad[:, :, idx]                                  # (B, C, L, K)
    ref = jnp.einsum("bclk,oclk->bol", x_unf, weight[0]) + bias
    assert out.shape == (B, O_ch, L)
    assert jnp.allclose(out, ref, atol=1e-5, rtol=1e-5)

    print("KERNEL_OK")
</pallas_src>

<mosaic_0001>
module attributes {stable_mosaic.version = 11 : i64} {
  func.func @_lc1d_kernel(%arg0: i32, %arg1: memref<2x16x128xf32, #tpu.memory_space<vmem>>, %arg2: memref<8x16x128xf32, #tpu.memory_space<vmem>>, %arg3: memref<8x128xf32, #tpu.memory_space<vmem>>, %arg4: memref<2x8x128xf32, #tpu.memory_space<vmem>>) attributes {dimension_semantics = [#tpu.dimension_semantics<parallel>], iteration_bounds = array<i64: 1>, scalar_prefetch = 0 : i64, scratch_operands = 0 : i64, tpu.core_type = #tpu.core_type<tc>, window_params = [{transform_indices = @transform_0, window_bounds = array<i64: 2, 16, 128>}, {transform_indices = @transform_1, window_bounds = array<i64: 8, 16, 128>}, {transform_indices = @transform_2, window_bounds = array<i64: 8, 128>}, {transform_indices = @transform_3, window_bounds = array<i64: 2, 8, 128>}]} {
    %c0 = arith.constant 0 : index
    %c0_0 = arith.constant 0 : index
    %c0_1 = arith.constant 0 : index
    %0 = vector.load %arg2[%c0, %c0_0, %c0_1] : memref<8x16x128xf32, #tpu.memory_space<vmem>>, vector<8x16x128xf32>
    %c0_2 = arith.constant 0 : index
    %c0_3 = arith.constant 0 : index
    %1 = vector.load %arg3[%c0_2, %c0_3] : memref<8x128xf32, #tpu.memory_space<vmem>>, vector<8x128xf32>
    %c0_4 = arith.constant 0 : index
    %c0_5 = arith.constant 0 : index
    %c0_6 = arith.constant 0 : index
    %2 = vector.load %arg1[%c0_4, %c0_5, %c0_6] : memref<2x16x128xf32, #tpu.memory_space<vmem>>, vector<1x16x128xf32>
    %3 = vector.shape_cast %2 : vector<1x16x128xf32> to vector<16x128xf32>
    %4 = vector.shape_cast %3 : vector<16x128xf32> to vector<1x16x128xf32>
    %5 = vector.broadcast %4 : vector<1x16x128xf32> to vector<8x16x128xf32>
    %6 = arith.mulf %5, %0 : vector<8x16x128xf32>
    %cst = arith.constant dense<0.000000e+00> : vector<8x128xf32>
    %7 = vector.multi_reduction <add>, %6, %cst [1] : vector<8x16x128xf32> to vector<8x128xf32>
    %8 = arith.addf %7, %1 : vector<8x128xf32>
    %c0_7 = arith.constant 0 : index
    %c0_8 = arith.constant 0 : index
    %c0_9 = arith.constant 0 : index
    %9 = vector.load %arg4[%c0_7, %c0_8, %c0_9] : memref<2x8x128xf32, #tpu.memory_space<vmem>>, vector<1x8x128xf32>
    %10 = vector.shape_cast %9 : vector<1x8x128xf32> to vector<8x128xf32>
    %11 = vector.shape_cast %8 : vector<8x128xf32> to vector<1x8x128xf32>
    tpu.vector_store %arg4[%c0_7, %c0_8, %c0_9], %11 {strides = array<i32>} : memref<2x8x128xf32, #tpu.memory_space<vmem>>, vector<1x8x128xf32>,
    %c1 = arith.constant 1 : index
    %c0_10 = arith.constant 0 : index
    %c0_11 = arith.constant 0 : index
    %12 = vector.load %arg1[%c1, %c0_10, %c0_11] : memref<2x16x128xf32, #tpu.memory_space<vmem>>, vector<1x16x128xf32>
    %13 = vector.shape_cast %12 : vector<1x16x128xf32> to vector<16x128xf32>
    %14 = vector.shape_cast %13 : vector<16x128xf32> to vector<1x16x128xf32>
    %15 = vector.broadcast %14 : vector<1x16x128xf32> to vector<8x16x128xf32>
    %16 = arith.mulf %15, %0 : vector<8x16x128xf32>
    %cst_12 = arith.constant dense<0.000000e+00> : vector<8x128xf32>
    %17 = vector.multi_reduction <add>, %16, %cst_12 [1] : vector<8x16x128xf32> to vector<8x128xf32>
    %18 = arith.addf %17, %1 : vector<8x128xf32>
    %c1_13 = arith.constant 1 : index
    %c0_14 = arith.constant 0 : index
    %c0_15 = arith.constant 0 : index
    %19 = vector.load %arg4[%c1_13, %c0_14, %c0_15] : memref<2x8x128xf32, #tpu.memory_space<vmem>>, vector<1x8x128xf32>
    %20 = vector.shape_cast %19 : vector<1x8x128xf32> to vector<8x128xf32>
    %21 = vector.shape_cast %18 : vector<8x128xf32> to vector<1x8x128xf32>
    tpu.vector_store %arg4[%c1_13, %c0_14, %c0_15], %21 {strides = array<i32>} : memref<2x8x128xf32, #tpu.memory_space<vmem>>, vector<1x8x128xf32>,
    return
  }
  func.func @transform_0(%arg0: i32) -> (i32, i32, i32) {
    %c0_i32 = arith.constant 0 : i32
    %c0_i32_0 = arith.constant 0 : i32
    %c0_i32_1 = arith.constant 0 : i32
    return %c0_i32, %c0_i32_0, %arg0 : i32, i32, i32
  }
  func.func @transform_1(%arg0: i32) -> (i32, i32, i32) {
    %c0_i32 = arith.constant 0 : i32
    %c0_i32_0 = arith.constant 0 : i32
    %c0_i32_1 = arith.constant 0 : i32
    return %c0_i32, %c0_i32_0, %arg0 : i32, i32, i32
  }
  func.func @transform_2(%arg0: i32) -> (i32, i32) {
    %c0_i32 = arith.constant 0 : i32
    %c0_i32_0 = arith.constant 0 : i32
    return %c0_i32, %arg0 : i32, i32
  }
  func.func @transform_3(%arg0: i32) -> (i32, i32, i32) {
    %c0_i32 = arith.constant 0 : i32
    %c0_i32_0 = arith.constant 0 : i32
    %c0_i32_1 = arith.constant 0 : i32
    return %c0_i32, %c0_i32_0, %arg0 : i32, i32, i32
  }
}

</mosaic_0001>

<bundles_post_ra>
// kernel: locally_connected_1d.1
= control target key start
LH: loop header
LB: loop body
LE: loop exit
PB: predicated region body
PF: predicated region fallthrough
CT: control target
= control target key end

     0   :  { %8 = vsyncpa [#allocation3], 0  ;;  %vm139_vm0 = vcmask 1041409   ;;  %vm142_vm1 = vcmask 1042434   ;;  %vm145_vm2 = vcmask 1043459   ;;  %vm148_vm3 = vcmask 1044484   ;;  %s529_s0 = inlined_call_operand.vmem [shape: f32[2,16,128], index: 0, kind: input, shape index: {}]   ;;  %s530_s1 = inlined_call_operand.vmem [shape: f32[8,16,128], index: 1, kind: input, shape index: {}]   ;;  %s531_s2 = inlined_call_operand.vmem [shape: f32[8,128], index: 2, kind: input, shape index: {}]   ;;  %s532_s3 = inlined_call_operand.hbm [shape: f32[2,8,128], index: 3, kind: output, shape index: {}]  }
   0x1   :  { %v340_v0 = vld [vmem:[%s530_s1] sm:$0xff]  ;;  %v345_v1 = vld [vmem:[%s530_s1 + $0x8] sm:$0xff]  ;;  %v350_v2 = vld [vmem:[%s530_s1 + $0x10] sm:$0xff]  ;;  %vm151_vm4 = vcmask 1045509   ;;  %vm154_vm5 = vcmask 1046534   ;;  %vm157_vm6 = vcmask 1047559  }
   0x2   :  { %v355_v3 = vld [vmem:[%s530_s1 + $0x18] sm:$0xff]  ;;  %v360_v4 = vld [vmem:[%s530_s1 + $0x20] sm:$0xff]  ;;  %v365_v5 = vld [vmem:[%s530_s1 + $0x28] sm:$0xff] }
   0x3   :  { %v370_v6 = vld [vmem:[%s530_s1 + $0x30] sm:$0xff]  ;;  %v375_v7 = vld [vmem:[%s530_s1 + $0x38] sm:$0xff]  ;;  %v380_v8 = vld [vmem:[%s530_s1 + $0x40] sm:$0xff] }
   0x4   :  { %v385_v9 = vld [vmem:[%s530_s1 + $0x48] sm:$0xff]  ;;  %v390_v10 = vld [vmem:[%s530_s1 + $0x50] sm:$0xff]  ;;  %v395_v11 = vld [vmem:[%s530_s1 + $0x58] sm:$0xff] }
   0x5   :  { %v400_v12 = vld [vmem:[%s530_s1 + $0x60] sm:$0xff]  ;;  %v33_v15 = vld [vmem:[%s529_s0 + $0x8] sm:$0xff]  ;;  %v425_v21 = vld [vmem:[%s530_s1 + $0x70] sm:$0xff] }
   0x6   :  { %v405_v13 = vld [vmem:[%s531_s2] sm:$0xff]  ;;  %v420_v20 = vld [vmem:[%s530_s1 + $0x68] sm:$0xff]  ;;  %v430_v22 = vld [vmem:[%s530_s1 + $0x78] sm:$0xff]  ;;  %v35_v24 = vmul.f32 %v33_v15, %v345_v1  ;;  %v37_v26 = vmul.f32 %v33_v15, %v355_v3  ;;  %v39_v28 = vmul.f32 %v33_v15, %v365_v5  ;;  %v41_v30 = vmul.f32 %v33_v15, %v375_v7 }
   0x7   :  { %v32_v14 = vld [vmem:[%s529_s0] sm:$0xff]  ;;  %v107_v16 = vrot.slane %v405_v13, 1  ;;  %v108_v17 = vrot.slane %v405_v13, 2  ;;  %v109_v18 = vrot.slane %v405_v13, 3  ;;  %v110_v19 = vrot.slane %v405_v13, 4 }
   0x8   :  { %v34_v23 = vmul.f32 %v32_v14, %v340_v0  ;;  %v36_v25 = vmul.f32 %v32_v14, %v350_v2  ;;  %v38_v27 = vmul.f32 %v32_v14, %v360_v4  ;;  %v40_v29 = vmul.f32 %v32_v14, %v370_v6 }
   0x9   :  { %v42_v31 = vmul.f32 %v32_v14, %v380_v8  ;;  %v43_v32 = vmul.f32 %v33_v15, %v385_v9  ;;  %v44_v33 = vmul.f32 %v32_v14, %v390_v10  ;;  %v45_v34 = vmul.f32 %v33_v15, %v395_v11 }
   0xa   :  { %v46_v35 = vmul.f32 %v32_v14, %v400_v12  ;;  %v47_v36 = vmul.f32 %v33_v15, %v420_v20  ;;  %v48_v37 = vmul.f32 %v32_v14, %v425_v21  ;;  %v49_v38 = vmul.f32 %v33_v15, %v430_v22 }
   0xb   :  { %v50_v39 = vadd.f32 %v35_v24, %v34_v23  ;;  %v57_v40 = vadd.f32 %v37_v26, %v36_v25  ;;  %v64_v41 = vadd.f32 %v39_v28, %v38_v27  ;;  %v71_v42 = vadd.f32 %v41_v30, %v40_v29 }
   0xc   :  { %v78_v43 = vadd.f32 %v43_v32, %v42_v31  ;;  %v85_v44 = vadd.f32 %v45_v34, %v44_v33  ;;  %v92_v45 = vadd.f32 %v47_v36, %v46_v35  ;;  %v99_v46 = vadd.f32 %v49_v38, %v48_v37 }
   0xd   :  { %v51_v47 = vrot.slane %v50_v39, 4  ;;  %v58_v48 = vrot.slane %v57_v40, 4  ;;  %v65_v49 = vrot.slane %v64_v41, 4  ;;  %v72_v50 = vrot.slane %v71_v42, 4 }
   0xe   :  { %v79_v51 = vrot.slane %v78_v43, 4  ;;  %v86_v52 = vrot.slane %v85_v44, 4  ;;  %v93_v53 = vrot.slane %v92_v45, 4  ;;  %v100_v54 = vrot.slane %v99_v46, 4 }
   0xf   :  { %v52_v55 = vadd.f32 %v51_v47, %v50_v39  ;;  %v59_v56 = vadd.f32 %v58_v48, %v57_v40  ;;  %v66_v57 = vadd.f32 %v65_v49, %v64_v41  ;;  %v73_v58 = vadd.f32 %v72_v50, %v71_v42 }
  0x10   :  { %v80_v59 = vadd.f32 %v79_v51, %v78_v43  ;;  %v87_v60 = vadd.f32 %v86_v52, %v85_v44  ;;  %v94_v61 = vadd.f32 %v93_v53, %v92_v45  ;;  %v101_v62 = vadd.f32 %v100_v54, %v99_v46 }
  0x11   :  { %v53_v63 = vrot.slane %v52_v55, 2  ;;  %v60_v14 = vrot.slane %v59_v56, 2  ;;  %v67_v15 = vrot.slane %v66_v57, 2  ;;  %v74_v23 = vrot.slane %v73_v58, 2 }
  0x12   :  { %v81_v24 = vrot.slane %v80_v59, 2  ;;  %v88_v25 = vrot.slane %v87_v60, 2  ;;  %v95_v26 = vrot.slane %v94_v61, 2  ;;  %v102_v27 = vrot.slane %v101_v62, 2 }
  0x13   :  { %v54_v28 = vadd.f32 %v53_v63, %v52_v55  ;;  %v61_v29 = vadd.f32 %v60_v14, %v59_v56  ;;  %v68_v30 = vadd.f32 %v67_v15, %v66_v57  ;;  %v75_v31 = vadd.f32 %v74_v23, %v73_v58  ;;  %v286_v14 = vld [vmem:[%s529_s0 + $0x18] sm:$0xff] }
  0x14   :  { %v82_v32 = vadd.f32 %v81_v24, %v80_v59  ;;  %v89_v33 = vadd.f32 %v88_v25, %v87_v60  ;;  %v96_v34 = vadd.f32 %v95_v26, %v94_v61  ;;  %v103_v35 = vadd.f32 %v102_v27, %v101_v62  ;;  %v285_v60 = vld [vmem:[%s529_s0 + $0x10] sm:$0xff]  ;;  %s314_s0 = smov [#allocation2]  }
  0x15   :  { %v55_v36 = vrot.slane %v54_v28, 1  ;;  %v62_v37 = vrot.slane %v61_v29, 1  ;;  %v69_v38 = vrot.slane %v68_v30, 1  ;;  %v76_v39 = vrot.slane %v75_v31, 1  ;;  %s274_s25 = sshll.u32 %s314_s0, 4  ;;  %s275_s25 = int_to_ptr.vmem [resolvable:$true] %s274_s25 }
  0x16   :  { %v83_v40 = vrot.slane %v82_v32, 1  ;;  %v90_v41 = vrot.slane %v89_v33, 1  ;;  %v97_v42 = vrot.slane %v96_v34, 1  ;;  %v104_v43 = vrot.slane %v103_v35, 1  ;;  %s290_s26 = scalar_lea.vmem %s275_s25, 256  ;;  %p295_p1 = scmp.lt.s32.totalorder %s275_s25, %s275_s25 }
  0x17   :  { %v56_v44 = vadd.f32 %v55_v36, %v54_v28  ;;  %v63_v45 = vadd.f32 %v62_v37, %v61_v29  ;;  %v70_v46 = vadd.f32 %v69_v38, %v68_v30  ;;  %v77_v47 = vadd.f32 %v76_v39, %v75_v31  ;;  %p291_p0 = scmp.ne.s32.totalorder %s275_s25, %s290_s26  ;;  %p296_p2 = scmp.lt.s32.totalorder %s290_s26, %s290_s26 }
  0x18   :  { %v84_v48 = vadd.f32 %v83_v40, %v82_v32  ;;  %v91_v49 = vadd.f32 %v90_v41, %v89_v33  ;;  %v98_v50 = vadd.f32 %v97_v42, %v96_v34  ;;  %v105_v51 = vadd.f32 %v104_v43, %v103_v35 }
  0x19   :  { %v111_v52 = vrot.slane %v405_v13, 5  ;;  %v112_v53 = vrot.slane %v405_v13, 6  ;;  %v113_v54 = vrot.slane %v405_v13, 7  ;;  %v122_v55 = vadd.f32 %v56_v44, %v405_v13  ;;  %p297_p3 = por %p296_p2, %p295_p1 }
  0x1a   :  { %v123_v56 = vadd.f32 %v107_v16, %v63_v45  ;;  %v124_v57 = vadd.f32 %v108_v17, %v70_v46  ;;  %v125_v58 = vadd.f32 %v109_v18, %v77_v47  ;;  %v126_v59 = vadd.f32 %v110_v19, %v84_v48 }
  0x1b   :  { %v127_v61 = vadd.f32 %v111_v52, %v91_v49  ;;  %v128_v62 = vadd.f32 %v112_v53, %v98_v50  ;;  %v129_v63 = vadd.f32 %v113_v54, %v105_v51  ;;  %v164_v15 = vmul.f32 %v285_v60, %v340_v0  ;;  %p298_p4 = pnand %p297_p3, %p291_p0 }
  0x1c   :  { %v138_v23 = vrot.slane %v123_v56, 7  ;;  %v141_v24 = vrot.slane %v124_v57, 6  ;;  %v144_v25 = vrot.slane %v125_v58, 5  ;;  %v147_v26 = vrot.slane %v126_v59, 4 }
  0x1d   :  { %v150_v27 = vrot.slane %v127_v61, 3  ;;  %v153_v28 = vrot.slane %v128_v62, 2  ;;  %v156_v29 = vrot.slane %v129_v63, 1  ;;  %v165_v30 = vmul.f32 %v286_v14, %v345_v1 }
  0x1e   :  { %v140_v31 = vsel %vm139_vm0, %v138_v23, %v122_v55  ;;  %v166_v32 = vmul.f32 %v285_v60, %v350_v2  ;;  %v167_v33 = vmul.f32 %v286_v14, %v355_v3  ;;  %v168_v34 = vmul.f32 %v285_v60, %v360_v4 }
  0x1f   :  { %v143_v35 = vsel %vm142_vm1, %v141_v24, %v140_v31  ;;  %v169_v0 = vmul.f32 %v286_v14, %v365_v5  ;;  %v170_v36 = vmul.f32 %v285_v60, %v370_v6  ;;  %v171_v37 = vmul.f32 %v286_v14, %v375_v7 }
  0x20   :  { %v146_v38 = vsel %vm145_vm2, %v144_v25, %v143_v35  ;;  %v172_v1 = vmul.f32 %v285_v60, %v380_v8  ;;  %v173_v39 = vmul.f32 %v286_v14, %v385_v9  ;;  %v174_v2 = vmul.f32 %v285_v60, %v390_v10 }
  0x21   :  { %v149_v3 = vsel %vm148_vm3, %v147_v26, %v146_v38  ;;  %v175_v4 = vmul.f32 %v286_v14, %v395_v11  ;;  %v176_v40 = vmul.f32 %v285_v60, %v400_v12  ;;  %v177_v5 = vmul.f32 %v286_v14, %v420_v20 }
  0x22   :  { %v152_v6 = vsel %vm151_vm4, %v150_v27, %v149_v3  ;;  %v178_v7 = vmul.f32 %v285_v60, %v425_v21  ;;  %v179_v41 = vmul.f32 %v286_v14, %v430_v22  ;;  %v180_v42 = vadd.f32 %v165_v30, %v164_v15 }
  0x23   :  { %v155_v8 = vsel %vm154_vm5, %v153_v28, %v152_v6  ;;  %v187_v9 = vadd.f32 %v167_v33, %v166_v32  ;;  %v194_v43 = vadd.f32 %v169_v0, %v168_v34  ;;  %v201_v10 = vadd.f32 %v171_v37, %v170_v36 }
  0x24   :  { %v158_v44 = vsel %vm157_vm6, %v156_v29, %v155_v8  ;;  %v181_v45 = vrot.slane %v180_v42, 4  ;;  %v208_v11 = vadd.f32 %v173_v39, %v172_v1  ;;  %v215_v46 = vadd.f32 %v175_v4, %v174_v2 }
  0x25   :  { %160 = vst [vmem:[#allocation2] sm:$0xff] %v158_v44  ;;  %v188_v12 = vrot.slane %v187_v9, 4  ;;  %v195_v20 = vrot.slane %v194_v43, 4  ;;  %v202_v47 = vrot.slane %v201_v10, 4  ;;  %v222_v48 = vadd.f32 %v177_v5, %v176_v40 }
  0x26   :  { %v182_v49 = vadd.f32 %v181_v45, %v180_v42  ;;  %v209_v21 = vrot.slane %v208_v11, 4  ;;  %v216_v50 = vrot.slane %v215_v46, 4  ;;  %v229_v22 = vadd.f32 %v179_v41, %v178_v7 }
  0x27   :  { %v189_v51 = vadd.f32 %v188_v12, %v187_v9  ;;  %v196_v55 = vadd.f32 %v195_v20, %v194_v43  ;;  %v203_v56 = vadd.f32 %v202_v47, %v201_v10  ;;  %v223_v57 = vrot.slane %v222_v48, 4 }
  0x28   :  { %v183_v58 = vrot.slane %v182_v49, 2  ;;  %v210_v59 = vadd.f32 %v209_v21, %v208_v11  ;;  %v217_v60 = vadd.f32 %v216_v50, %v215_v46  ;;  %v230_v61 = vrot.slane %v229_v22, 4 }
  0x29   :  { %v190_v62 = vrot.slane %v189_v51, 2  ;;  %v197_v63 = vrot.slane %v196_v55, 2  ;;  %v204_v14 = vrot.slane %v203_v56, 2  ;;  %v224_v15 = vadd.f32 %v223_v57, %v222_v48 }
  0x2a   :  { %v184_v23 = vadd.f32 %v183_v58, %v182_v49  ;;  %v211_v24 = vrot.slane %v210_v59, 2  ;;  %v218_v25 = vrot.slane %v217_v60, 2  ;;  %v231_v26 = vadd.f32 %v230_v61, %v229_v22 }
  0x2b   :  { %v191_v27 = vadd.f32 %v190_v62, %v189_v51  ;;  %v198_v28 = vadd.f32 %v197_v63, %v196_v55  ;;  %v205_v29 = vadd.f32 %v204_v14, %v203_v56  ;;  %v225_v30 = vrot.slane %v224_v15, 2 }
  0x2c   :  { %v185_v31 = vrot.slane %v184_v23, 1  ;;  %v212_v32 = vadd.f32 %v211_v24, %v210_v59  ;;  %v219_v33 = vadd.f32 %v218_v25, %v217_v60  ;;  %v232_v34 = vrot.slane %v231_v26, 2 }
  0x2d   :  { %v192_v35 = vrot.slane %v191_v27, 1  ;;  %v199_v0 = vrot.slane %v198_v28, 1  ;;  %v206_v36 = vrot.slane %v205_v29, 1  ;;  %v226_v37 = vadd.f32 %v225_v30, %v224_v15 }
  0x2e   :  { %v186_v38 = vadd.f32 %v185_v31, %v184_v23  ;;  %v213_v1 = vrot.slane %v212_v32, 1  ;;  %v220_v39 = vrot.slane %v219_v33, 1  ;;  %v233_v2 = vadd.f32 %v232_v34, %v231_v26 }
  0x2f   :  { %v193_v3 = vadd.f32 %v192_v35, %v191_v27  ;;  %v200_v4 = vadd.f32 %v199_v0, %v198_v28  ;;  %v207_v40 = vadd.f32 %v206_v36, %v205_v29  ;;  %v227_v5 = vrot.slane %v226_v37, 1 }
  0x30   :  { %v214_v6 = vadd.f32 %v213_v1, %v212_v32  ;;  %v221_v7 = vadd.f32 %v220_v39, %v219_v33  ;;  %v234_v41 = vrot.slane %v233_v2, 1  ;;  %v236_v42 = vadd.f32 %v186_v38, %v405_v13 }
  0x31   :  { %v228_v8 = vadd.f32 %v227_v5, %v226_v37  ;;  %v237_v9 = vadd.f32 %v193_v3, %v107_v16  ;;  %v238_v43 = vadd.f32 %v200_v4, %v108_v17  ;;  %v239_v10 = vadd.f32 %v207_v40, %v109_v18 }
  0x32   :  { %v235_v44 = vadd.f32 %v234_v41, %v233_v2  ;;  %v240_v45 = vadd.f32 %v214_v6, %v110_v19  ;;  %v241_v11 = vadd.f32 %v221_v7, %v111_v52 }
  0x33   :  { %v242_v46 = vadd.f32 %v228_v8, %v112_v53  ;;  %v252_v12 = vrot.slane %v237_v9, 7  ;;  %v254_v20 = vrot.slane %v238_v43, 6  ;;  %v256_v47 = vrot.slane %v239_v10, 5 }
  0x34   :  { %v243_v16 = vadd.f32 %v235_v44, %v113_v54  ;;  %v258_v17 = vrot.slane %v240_v45, 4  ;;  %v260_v18 = vrot.slane %v241_v11, 3 }
  0x35   :  { %v253_v48 = vsel %vm139_vm0, %v252_v12, %v236_v42  ;;  %v262_v21 = vrot.slane %v242_v46, 2 }
  0x36   :  { %v255_v49 = vsel %vm142_vm1, %v254_v20, %v253_v48  ;;  %v264_v50 = vrot.slane %v243_v16, 1 }
  0x37   :  { %v257_v19 = vsel %vm145_vm2, %v256_v47, %v255_v49 }
  0x38   :  { %v259_v52 = vsel %vm148_vm3, %v258_v17, %v257_v19 }
  0x39   :  { %v261_v53 = vsel %vm151_vm4, %v260_v18, %v259_v52 }
  0x3a   :  { %v263_v22 = vsel %vm154_vm5, %v262_v21, %v261_v53 }
  0x3b   :  { %v265_v13 = vsel %vm157_vm6, %v264_v50, %v263_v22 }
  0x3c   :  { %268 = vst [vmem:[#allocation2 + $0x8] sm:$0xff] %v265_v13 }
  0x3d   :  { %301 = shalt.err (!%p298_p4)
}
  0x3e   :  { %s302_s29 = scalar_lea.hbm %s532_s3, 256 }
  0x3f   :  { %p303_p5 = scmp.ne.s32.totalorder %s532_s3, %s302_s29  ;;  %p306_p6 = scmp.lt.u32.totalorder %s302_s29, %s532_s3 }
  0x41   :  { %p308_p7 = pnand %p306_p6, %p303_p5 }
  0x43   :  { %311 = shalt.err (!%p308_p7)
}
  0x44   :  { %s315_s7 = smov 128   ;;  %s316_s8 = smov 8  }
  0x45   :  { %280 = dma.vmem_to_hbm [thread:$0]  %s275_s25, 256, %s532_s3, [#allocation3], %s315_s7, %s315_s7, %s316_s8  }
  0x46   :  { %312 = dma.done.wait [#allocation3], 256  }
  0x47   :  { %313 = vsyncadd [#allocation3], 4294967040 }
  0x48   :  { %284 = vsyncpa [#allocation3], 1 }

</bundles_post_ra>
